<compile_context>
chip_gen: v7x
topology: tpu7x:2x2x1
jax: 0.10.0
libtpu: 0.0.40
codegen_flags: <defaults>
</compile_context>

<pallas_src>
import jax
import jax.numpy as jnp
from jax.experimental import pallas as pl
from jax.experimental.pallas import tpu as pltpu

HIDDEN = 128   # nn.Linear(input_dim, 128) hidden width (lane-aligned already)
LANE = 128


def _round_up(x, m):
    return (x + m - 1) // m * m


def autoencoder_kernel(x_ref,
                       w1_ref, b1_ref,
                       w2_ref, b2_ref,
                       w3_ref, b3_ref,
                       w4_ref, b4_ref,
                       out_ref):
    """Fused encoder + decoder forward for one batch tile."""
    x = x_ref[...]                                                # (bt, D_in) f32

    # encoder: Linear(D_in, 128) -> ReLU -> Linear(128, latent)
    h1 = jnp.dot(x, w1_ref[...], preferred_element_type=jnp.float32) + b1_ref[...]
    h1 = jnp.maximum(h1, 0.0)                                     # ReLU
    z = jnp.dot(h1, w2_ref[...], preferred_element_type=jnp.float32) + b2_ref[...]

    # decoder: Linear(latent, 128) -> ReLU -> Linear(128, D_in)
    h2 = jnp.dot(z, w3_ref[...], preferred_element_type=jnp.float32) + b3_ref[...]
    h2 = jnp.maximum(h2, 0.0)                                     # ReLU
    recon = jnp.dot(h2, w4_ref[...], preferred_element_type=jnp.float32) + b4_ref[...]

    out_ref[...] = recon.astype(out_ref.dtype)                    # narrow (bt, D_in) store


def prepare_params(params):
    """One-time prep (NOT per forward call): pad the latent dim to the 128-lane
    width so both inner matmuls run on aligned shapes.  Zero padding is
    mathematically neutral (padded z lanes stay exactly 0).  Weights are stored
    as (in_features, out_features) so the kernel computes y = x @ W + b."""
    w1, b1 = params["w1"], params["b1"]            # (D_in, 128), (1, 128)
    w2, b2 = params["w2"], params["b2"]            # (128, L),    (1, L)
    w3, b3 = params["w3"], params["b3"]            # (L, 128),    (1, 128)
    w4, b4 = params["w4"], params["b4"]            # (128, D_in), (1, D_in)
    L = w2.shape[1]
    L_pad = _round_up(L, LANE)
    if L_pad != L:
        w2 = jnp.pad(w2, ((0, 0), (0, L_pad - L)))
        b2 = jnp.pad(b2, ((0, 0), (0, L_pad - L)))
        w3 = jnp.pad(w3, ((0, L_pad - L), (0, 0)))
    return (w1, b1, w2, b2, w3, b3, w4, b4)


def autoencoder_forward(x, prepped, *, batch_tile=1024):
    """x: (B, D_in) float32. prepped: output of prepare_params (reused across calls)."""
    w1, b1, w2, b2, w3, b3, w4, b4 = prepped
    B, D_in = x.shape

    # ---- batch tile: multiple of 8, as large as allowed (amortizes the
    #      ~0.35us/step pipeline overhead), capped by actual VMEM footprint:
    #      double-buffered x + out tiles (4 * bt * D_in * 4B) plus f32
    #      intermediates h1/z/h2 (3 * bt * 128 * 4B). ------------------------
    per_row_bytes = 4 * (4 * D_in + 3 * HIDDEN)
    vmem_budget = 16 * 1024 * 1024                     # conservative, fits all gens
    max_bt = max(8, (vmem_budget // per_row_bytes) // 8 * 8)
    bt = _round_up(max(min(batch_tile, B), 1), 8)
    bt = min(bt, max_bt)

    B_pad = _round_up(B, bt)
    x_p = jnp.pad(x, ((0, B_pad - B), (0, 0))) if B_pad != B else x
    grid = (B_pad // bt,)

    def resident(arr):
        r, c = arr.shape
        return pl.BlockSpec((r, c), lambda i: (0, 0))   # same block every step

    out = pl.pallas_call(
        autoencoder_kernel,
        out_shape=jax.ShapeDtypeStruct((B_pad, D_in), x.dtype),
        grid=grid,
        in_specs=[
            pl.BlockSpec((bt, D_in), lambda i: (i, 0)),    # narrow x tile
            resident(w1), resident(b1),
            resident(w2), resident(b2),
            resident(w3), resident(b3),
            resident(w4), resident(b4),
        ],
        out_specs=pl.BlockSpec((bt, D_in), lambda i: (i, 0)),  # narrow out tile
        compiler_params=pltpu.CompilerParams(
            dimension_semantics=("parallel",),
        ),
    )(x_p, w1, b1, w2, b2, w3, b3, w4, b4)

    return out[:B] if B_pad != B else out


def init_params(key, input_dim, latent_dim=20, hidden=HIDDEN):
    """nn.Linear-style init (U[-1/sqrt(fan_in), +1/sqrt(fan_in)]).
    Weights stored as (in_features, out_features)."""
    def linear(key, fan_in, fan_out):
        kw, kb = jax.random.split(key)
        bound = 1.0 / jnp.sqrt(float(fan_in))
        w = jax.random.uniform(kw, (fan_in, fan_out), jnp.float32, -bound, bound)
        b = jax.random.uniform(kb, (1, fan_out), jnp.float32, -bound, bound)
        return w, b

    k1, k2, k3, k4 = jax.random.split(key, 4)
    w1, b1 = linear(k1, input_dim, hidden)
    w2, b2 = linear(k2, hidden, latent_dim)
    w3, b3 = linear(k3, latent_dim, hidden)
    w4, b4 = linear(k4, hidden, input_dim)
    return {"w1": w1, "b1": b1, "w2": w2, "b2": b2,
            "w3": w3, "b3": b3, "w4": w4, "b4": b4}


def reference_forward(x, p):
    h = jnp.maximum(x @ p["w1"] + p["b1"], 0.0)
    z = h @ p["w2"] + p["b2"]
    h = jnp.maximum(z @ p["w3"] + p["b3"], 0.0)
    return h @ p["w4"] + p["b4"]


if __name__ == "__main__":
    # TODO(synk): parquet loading + StandardScaler preprocessing from the original
    # script are host-side data prep, not part of the module forward; synthetic
    # standardized inputs are used instead.
    key = jax.random.PRNGKey(0)
    kx, kp = jax.random.split(key)

    batch = 64          # small demo size
    input_dim = 32      # stands in for the tabular feature count from the parquet
    latent_dim = 20

    x = jax.random.normal(kx, (batch, input_dim), jnp.float32)
    params = init_params(kp, input_dim, latent_dim)
    prepped = prepare_params(params)        # one-time; reused across forward calls

    out = jax.block_until_ready(autoencoder_forward(x, prepped))
    ref = reference_forward(x, params)
    assert out.shape == (batch, input_dim)
    assert jnp.allclose(out, ref, atol=1e-4, rtol=1e-4)

    # non-multiple-of-8 batch exercises the pad-and-slice path
    x_odd = jax.random.normal(kx, (batch + 5, input_dim), jnp.float32)
    out_odd = jax.block_until_ready(autoencoder_forward(x_odd, prepped))
    assert out_odd.shape == (batch + 5, input_dim)
    assert jnp.allclose(out_odd, reference_forward(x_odd, params), atol=1e-4, rtol=1e-4)

    print("KERNEL_OK")
</pallas_src>

<mosaic_0001>
module attributes {stable_mosaic.version = 11 : i64} {
  func.func @autoencoder_kernel(%arg0: i32, %arg1: memref<64x32xf32, #tpu.memory_space<vmem>>, %arg2: memref<32x128xf32, #tpu.memory_space<vmem>>, %arg3: memref<1x128xf32, #tpu.memory_space<vmem>>, %arg4: memref<128x128xf32, #tpu.memory_space<vmem>>, %arg5: memref<1x128xf32, #tpu.memory_space<vmem>>, %arg6: memref<128x128xf32, #tpu.memory_space<vmem>>, %arg7: memref<1x128xf32, #tpu.memory_space<vmem>>, %arg8: memref<128x32xf32, #tpu.memory_space<vmem>>, %arg9: memref<1x32xf32, #tpu.memory_space<vmem>>, %arg10: memref<64x32xf32, #tpu.memory_space<vmem>>) attributes {dimension_semantics = [#tpu.dimension_semantics<parallel>], iteration_bounds = array<i64: 1>, scalar_prefetch = 0 : i64, scratch_operands = 0 : i64, tpu.core_type = #tpu.core_type<tc>, window_params = [{transform_indices = @transform_0, window_bounds = array<i64: 64, 32>}, {pipeline_mode = #tpu.pipeline_mode<synchronous>, transform_indices = @transform_1, window_bounds = array<i64: 32, 128>}, {pipeline_mode = #tpu.pipeline_mode<synchronous>, transform_indices = @transform_2, window_bounds = array<i64: 1, 128>}, {pipeline_mode = #tpu.pipeline_mode<synchronous>, transform_indices = @transform_3, window_bounds = array<i64: 128, 128>}, {pipeline_mode = #tpu.pipeline_mode<synchronous>, transform_indices = @transform_4, window_bounds = array<i64: 1, 128>}, {pipeline_mode = #tpu.pipeline_mode<synchronous>, transform_indices = @transform_5, window_bounds = array<i64: 128, 128>}, {pipeline_mode = #tpu.pipeline_mode<synchronous>, transform_indices = @transform_6, window_bounds = array<i64: 1, 128>}, {pipeline_mode = #tpu.pipeline_mode<synchronous>, transform_indices = @transform_7, window_bounds = array<i64: 128, 32>}, {pipeline_mode = #tpu.pipeline_mode<synchronous>, transform_indices = @transform_8, window_bounds = array<i64: 1, 32>}, {transform_indices = @transform_9, window_bounds = array<i64: 64, 32>}]} {
    %c0 = arith.constant 0 : index
    %c0_0 = arith.constant 0 : index
    %0 = vector.load %arg1[%c0, %c0_0] : memref<64x32xf32, #tpu.memory_space<vmem>>, vector<64x32xf32>
    %c0_1 = arith.constant 0 : index
    %c0_2 = arith.constant 0 : index
    %1 = vector.load %arg2[%c0_1, %c0_2] : memref<32x128xf32, #tpu.memory_space<vmem>>, vector<32x128xf32>
    %cst = arith.constant dense<0.000000e+00> : vector<64x128xf32>
    %2 = tpu.matmul %0, %1, %cst {dimension_numbers = #tpu.dot_dimension_numbers<[1], [0], [0], [1], [0, 0, 1, 1], [], []>} : vector<64x32xf32>, vector<32x128xf32>, vector<64x128xf32> -> vector<64x128xf32>
    %c0_3 = arith.constant 0 : index
    %c0_4 = arith.constant 0 : index
    %3 = vector.load %arg3[%c0_3, %c0_4] : memref<1x128xf32, #tpu.memory_space<vmem>>, vector<1x128xf32>
    %4 = vector.broadcast %3 : vector<1x128xf32> to vector<64x128xf32>
    %5 = arith.addf %2, %4 : vector<64x128xf32>
    %cst_5 = arith.constant 0.000000e+00 : f32
    %6 = vector.broadcast %cst_5 : f32 to vector<64x128xf32>
    %7 = arith.maximumf %5, %6 : vector<64x128xf32>
    %c0_6 = arith.constant 0 : index
    %c0_7 = arith.constant 0 : index
    %8 = vector.load %arg4[%c0_6, %c0_7] : memref<128x128xf32, #tpu.memory_space<vmem>>, vector<128x128xf32>
    %cst_8 = arith.constant dense<0.000000e+00> : vector<64x128xf32>
    %9 = tpu.matmul %7, %8, %cst_8 {dimension_numbers = #tpu.dot_dimension_numbers<[1], [0], [0], [1], [0, 0, 1, 1], [], []>} : vector<64x128xf32>, vector<128x128xf32>, vector<64x128xf32> -> vector<64x128xf32>
    %c0_9 = arith.constant 0 : index
    %c0_10 = arith.constant 0 : index
    %10 = vector.load %arg5[%c0_9, %c0_10] : memref<1x128xf32, #tpu.memory_space<vmem>>, vector<1x128xf32>
    %11 = vector.broadcast %10 : vector<1x128xf32> to vector<64x128xf32>
    %12 = arith.addf %9, %11 : vector<64x128xf32>
    %c0_11 = arith.constant 0 : index
    %c0_12 = arith.constant 0 : index
    %13 = vector.load %arg6[%c0_11, %c0_12] : memref<128x128xf32, #tpu.memory_space<vmem>>, vector<128x128xf32>
    %cst_13 = arith.constant dense<0.000000e+00> : vector<64x128xf32>
    %14 = tpu.matmul %12, %13, %cst_13 {dimension_numbers = #tpu.dot_dimension_numbers<[1], [0], [0], [1], [0, 0, 1, 1], [], []>} : vector<64x128xf32>, vector<128x128xf32>, vector<64x128xf32> -> vector<64x128xf32>
    %c0_14 = arith.constant 0 : index
    %c0_15 = arith.constant 0 : index
    %15 = vector.load %arg7[%c0_14, %c0_15] : memref<1x128xf32, #tpu.memory_space<vmem>>, vector<1x128xf32>
    %16 = vector.broadcast %15 : vector<1x128xf32> to vector<64x128xf32>
    %17 = arith.addf %14, %16 : vector<64x128xf32>
    %cst_16 = arith.constant 0.000000e+00 : f32
    %18 = vector.broadcast %cst_16 : f32 to vector<64x128xf32>
    %19 = arith.maximumf %17, %18 : vector<64x128xf32>
    %c0_17 = arith.constant 0 : index
    %c0_18 = arith.constant 0 : index
    %20 = vector.load %arg8[%c0_17, %c0_18] : memref<128x32xf32, #tpu.memory_space<vmem>>, vector<128x32xf32>
    %cst_19 = arith.constant dense<0.000000e+00> : vector<64x32xf32>
    %21 = tpu.matmul %19, %20, %cst_19 {dimension_numbers = #tpu.dot_dimension_numbers<[1], [0], [0], [1], [0, 0, 1, 1], [], []>} : vector<64x128xf32>, vector<128x32xf32>, vector<64x32xf32> -> vector<64x32xf32>
    %c0_20 = arith.constant 0 : index
    %c0_21 = arith.constant 0 : index
    %22 = vector.load %arg9[%c0_20, %c0_21] : memref<1x32xf32, #tpu.memory_space<vmem>>, vector<1x32xf32>
    %23 = vector.broadcast %22 : vector<1x32xf32> to vector<64x32xf32>
    %24 = arith.addf %21, %23 : vector<64x32xf32>
    %c0_22 = arith.constant 0 : index
    %c0_23 = arith.constant 0 : index
    %25 = vector.load %arg10[%c0_22, %c0_23] : memref<64x32xf32, #tpu.memory_space<vmem>>, vector<64x32xf32>
    tpu.vector_store %arg10[%c0_22, %c0_23], %24 {strides = array<i32>} : memref<64x32xf32, #tpu.memory_space<vmem>>, vector<64x32xf32>,
    return
  }
  func.func @transform_0(%arg0: i32) -> (i32, i32) {
    %c0_i32 = arith.constant 0 : i32
    %c0_i32_0 = arith.constant 0 : i32
    return %arg0, %c0_i32 : i32, i32
  }
  func.func @transform_1(%arg0: i32) -> (i32, i32) {
    %c0_i32 = arith.constant 0 : i32
    %c0_i32_0 = arith.constant 0 : i32
    %c0_i32_1 = arith.constant 0 : i32
    return %c0_i32, %c0_i32_0 : i32, i32
  }
  func.func @transform_2(%arg0: i32) -> (i32, i32) {
    %c0_i32 = arith.constant 0 : i32
    %c0_i32_0 = arith.constant 0 : i32
    %c0_i32_1 = arith.constant 0 : i32
    return %c0_i32, %c0_i32_0 : i32, i32
  }
  func.func @transform_3(%arg0: i32) -> (i32, i32) {
    %c0_i32 = arith.constant 0 : i32
    %c0_i32_0 = arith.constant 0 : i32
    %c0_i32_1 = arith.constant 0 : i32
    return %c0_i32, %c0_i32_0 : i32, i32
  }
  func.func @transform_4(%arg0: i32) -> (i32, i32) {
    %c0_i32 = arith.constant 0 : i32
    %c0_i32_0 = arith.constant 0 : i32
    %c0_i32_1 = arith.constant 0 : i32
    return %c0_i32, %c0_i32_0 : i32, i32
  }
  func.func @transform_5(%arg0: i32) -> (i32, i32) {
    %c0_i32 = arith.constant 0 : i32
    %c0_i32_0 = arith.constant 0 : i32
    %c0_i32_1 = arith.constant 0 : i32
    return %c0_i32, %c0_i32_0 : i32, i32
  }
  func.func @transform_6(%arg0: i32) -> (i32, i32) {
    %c0_i32 = arith.constant 0 : i32
    %c0_i32_0 = arith.constant 0 : i32
    %c0_i32_1 = arith.constant 0 : i32
    return %c0_i32, %c0_i32_0 : i32, i32
  }
  func.func @transform_7(%arg0: i32) -> (i32, i32) {
    %c0_i32 = arith.constant 0 : i32
    %c0_i32_0 = arith.constant 0 : i32
    %c0_i32_1 = arith.constant 0 : i32
    return %c0_i32, %c0_i32_0 : i32, i32
  }
  func.func @transform_8(%arg0: i32) -> (i32, i32) {
    %c0_i32 = arith.constant 0 : i32
    %c0_i32_0 = arith.constant 0 : i32
    %c0_i32_1 = arith.constant 0 : i32
    return %c0_i32, %c0_i32_0 : i32, i32
  }
  func.func @transform_9(%arg0: i32) -> (i32, i32) {
    %c0_i32 = arith.constant 0 : i32
    %c0_i32_0 = arith.constant 0 : i32
    return %arg0, %c0_i32 : i32, i32
  }
}

</mosaic_0001>

<bundles_post_ra>
// kernel: tpu_custom_call.1
= control target key start
LH: loop header
LB: loop body
LE: loop exit
PB: predicated region body
PF: predicated region fallthrough
CT: control target
= control target key end

     0   :  { %14 = vsyncpa [#allocation3], 0  ;;  %s1003_s30 = smov [#allocation2]   ;;  %s1288_s0 = inlined_call_operand.vmem [shape: f32[64,32], index: 0, kind: input, shape index: {}]   ;;  %s1289_s1 = inlined_call_operand.hbm [shape: f32[32,128], index: 1, kind: input, shape index: {}]   ;;  %s1290_s2 = inlined_call_operand.vmem [shape: f32[1,128], index: 2, kind: input, shape index: {}]   ;;  %s1291_s3 = inlined_call_operand.vmem [shape: f32[128,128], index: 3, kind: input, shape index: {}]   ;;  %s1292_s4 = inlined_call_operand.vmem [shape: f32[1,128], index: 4, kind: input, shape index: {}]   ;;  %s1293_s5 = inlined_call_operand.vmem [shape: f32[128,128], index: 5, kind: input, shape index: {}]   ;;  %s1294_s6 = inlined_call_operand.vmem [shape: f32[1,128], index: 6, kind: input, shape index: {}]   ;;  %s1295_s7 = inlined_call_operand.vmem [shape: f32[128,32], index: 7, kind: input, shape index: {}]   ;;  %s1296_s8 = inlined_call_operand.vmem [shape: f32[1,32], index: 8, kind: input, shape index: {}]   ;;  %s1297_s9 = inlined_call_operand.vmem [shape: f32[64,32], index: 9, kind: output, shape index: {}]  }
   0x1   :  { %s22_s10 = sshll.u32 %s1003_s30, 4  ;;  %s979_s13 = scalar_lea.hbm %s1289_s1, 512  ;;  %s23_s10 = int_to_ptr.vmem [resolvable:$true] %s22_s10 }
   0x2   :  { %p980_p0 = scmp.ne.s32.totalorder %s1289_s1, %s979_s13  ;;  %p983_p1 = scmp.lt.u32.totalorder %s979_s13, %s1289_s1 }
   0x4   :  { %p985_p2 = pnand %p983_p1, %p980_p0 }
   0x6   :  { %988 = shalt.err (!%p985_p2)
}
   0x7   :  { %s989_s18 = scalar_lea.vmem %s23_s10, 512  ;;  %p994_p4 = scmp.lt.s32.totalorder %s23_s10, %s23_s10 }
   0x8   :  { %p990_p3 = scmp.ne.s32.totalorder %s23_s10, %s989_s18  ;;  %p995_p5 = scmp.lt.s32.totalorder %s989_s18, %s989_s18 }
   0xa   :  { %p996_p6 = por %p995_p5, %p994_p4 }
   0xc   :  { %p997_p7 = pnand %p996_p6, %p990_p3 }
   0xe   :  { %1000 = shalt.err (!%p997_p7)
}
   0xf   :  { %s1004_s19 = smov 128   ;;  %s1005_s20 = smov 8  }
  0x10   :  { %28 = dma.hbm_to_vmem [thread:$0]  %s1289_s1, 512, %s23_s10, [#allocation3], %s1004_s19, %s1004_s19, %s1005_s20  }
  0x11   :  { %1001 = dma.done.wait [#allocation3], 512  }
  0x12   :  { %1002 = vsyncadd [#allocation3], 4294966784  ;;  %vm65_vm0 = vcmask 261120   ;;  %v54_v0 = vld [vmem:[#allocation2] sm:$0xff]  ;;  %v55_v1 = vld [vmem:[#allocation2 + $0x8] sm:$0xff] }
  0x13   :  { %v56_v2 = vld [vmem:[#allocation2 + $0x10] sm:$0xff]  ;;  %v856_v3 = vpack.c.bf16 %v55_v1, %v54_v0  ;;  %v57_v4 = vld [vmem:[#allocation2 + $0x18] sm:$0xff]  ;;  %v46_v5 = vld [vmem:[%s1288_s0] sm:$0xff] }
  0x14   :  { %v860_v6 = vpack.c.bf16 %v57_v4, %v56_v2  ;;  %712 = vmatprep.mubr.msk.f32.mxu0 %vm65_vm0, %v46_v5  ;;  %v203_v7 = vld [vmem:[%s1291_s3] sm:$0xff]  ;;  %v204_v8 = vld [vmem:[%s1291_s3 + $0x8] sm:$0xff]  ;;  %v205_v9 = vld [vmem:[%s1291_s3 + $0x10] sm:$0xff] }
  0x15   :  { %857 = vmatprep.subr.bf16.mxu0 %v856_v3  ;;  %v864_v10 = vpack.c.bf16 %v204_v8, %v203_v7  ;;  %v206_v11 = vld [vmem:[%s1291_s3 + $0x18] sm:$0xff]  ;;  %v207_v13 = vld [vmem:[%s1291_s3 + $0x20] sm:$0xff]  ;;  %v208_v14 = vld [vmem:[%s1291_s3 + $0x28] sm:$0xff] }
  0x16   :  { %859 = vmatpush3.bf16.msra.mxu0 %v856_v3  ;;  %v868_v12 = vpack.c.bf16 %v206_v11, %v205_v9  ;;  %v47_v15 = vld [vmem:[%s1288_s0 + $0x8] sm:$0xff]  ;;  %v48_v16 = vld [vmem:[%s1288_s0 + $0x10] sm:$0xff]  ;;  %v872_v17 = vpack.c.bf16 %v208_v14, %v207_v13  ;;  %v210_v19 = vld [vmem:[%s1291_s3 + $0x38] sm:$0xff] }
  0x17   :  { %861 = vmatprep.subr.bf16.mxu0 %v860_v6  ;;  %865 = vmatprep.subr.bf16.mxu1 %v864_v10  ;;  %v209_v18 = vld [vmem:[%s1291_s3 + $0x30] sm:$0xff]  ;;  %v49_v20 = vld [vmem:[%s1288_s0 + $0x18] sm:$0xff]  ;;  %v50_v21 = vld [vmem:[%s1288_s0 + $0x20] sm:$0xff] }
  0x18   :  { %867 = vmatpush3.bf16.msra.mxu1 %v864_v10  ;;  %v876_v22 = vpack.c.bf16 %v210_v19, %v209_v18  ;;  %v211_v23 = vld [vmem:[%s1291_s3 + $0x40] sm:$0xff]  ;;  %v212_v24 = vld [vmem:[%s1291_s3 + $0x48] sm:$0xff]  ;;  %v52_v26 = vld [vmem:[%s1288_s0 + $0x30] sm:$0xff] }
  0x19   :  { %869 = vmatprep.subr.bf16.mxu1 %v868_v12  ;;  %v51_v25 = vld [vmem:[%s1288_s0 + $0x28] sm:$0xff]  ;;  %v880_v27 = vpack.c.bf16 %v212_v24, %v211_v23  ;;  %v213_v28 = vld [vmem:[%s1291_s3 + $0x50] sm:$0xff]  ;;  %v214_v29 = vld [vmem:[%s1291_s3 + $0x58] sm:$0xff] }
  0x1a   :  { %863 = vmatpush3.bf16.msra.mxu0 %v860_v6  ;;  %v53_v30 = vld [vmem:[%s1288_s0 + $0x38] sm:$0xff]  ;;  %v884_v31 = vpack.c.bf16 %v214_v29, %v213_v28  ;;  %v215_v32 = vld [vmem:[%s1291_s3 + $0x60] sm:$0xff]  ;;  %v216_v33 = vld [vmem:[%s1291_s3 + $0x68] sm:$0xff] }
  0x1b   :  { %v888_v34 = vpack.c.bf16 %v216_v33, %v215_v32  ;;  %v217_v35 = vld [vmem:[%s1291_s3 + $0x70] sm:$0xff]  ;;  %v218_v36 = vld [vmem:[%s1291_s3 + $0x78] sm:$0xff]  ;;  %v331_v38 = vld [vmem:[%s1293_s5] sm:$0xff] }
  0x1c   :  { %871 = vmatpush3.bf16.msra.mxu1 %v868_v12  ;;  %v892_v37 = vpack.c.bf16 %v218_v36, %v217_v35  ;;  %v332_v39 = vld [vmem:[%s1293_s5 + $0x8] sm:$0xff]  ;;  %v333_v40 = vld [vmem:[%s1293_s5 + $0x10] sm:$0xff]  ;;  %v334_v42 = vld [vmem:[%s1293_s5 + $0x18] sm:$0xff] }
  0x1d   :  { %713 = vmatmul.mubr.msk.f32.vlgmr.msra.gmra.mrb[0].mxu0 %vm65_vm0, %v47_v15  ;;  %873 = vmatprep.subr.bf16.mxu1 %v872_v17  ;;  %v896_v41 = vpack.c.bf16 %v332_v39, %v331_v38  ;;  %v900_v43 = vpack.c.bf16 %v334_v42, %v333_v40  ;;  %v335_v44 = vld [vmem:[%s1293_s5 + $0x20] sm:$0xff]  ;;  %v336_v45 = vld [vmem:[%s1293_s5 + $0x28] sm:$0xff]  ;;  %v337_v47 = vld [vmem:[%s1293_s5 + $0x30] sm:$0xff] }
  0x1e   :  { %715 = vmatprep.mubr.msk.f32.mxu0 %vm65_vm0, %v48_v16  ;;  %v904_v46 = vpack.c.bf16 %v336_v45, %v335_v44  ;;  %v338_v48 = vld [vmem:[%s1293_s5 + $0x38] sm:$0xff]  ;;  %v339_v50 = vld [vmem:[%s1293_s5 + $0x40] sm:$0xff]  ;;  %v340_v51 = vld [vmem:[%s1293_s5 + $0x48] sm:$0xff] }
  0x1f   :  { %897 = vmatprep.subr.bf16.mxu0 %v896_v41  ;;  %v908_v49 = vpack.c.bf16 %v338_v48, %v337_v47  ;;  %v912_v52 = vpack.c.bf16 %v340_v51, %v339_v50  ;;  %v341_v53 = vld [vmem:[%s1293_s5 + $0x50] sm:$0xff]  ;;  %v342_v54 = vld [vmem:[%s1293_s5 + $0x58] sm:$0xff]  ;;  %v343_v56 = vld [vmem:[%s1293_s5 + $0x60] sm:$0xff] }
  0x20   :  { %875 = vmatpush3.bf16.msra.mxu1 %v872_v17  ;;  %899 = vmatpush3.bf16.msra.mxu0 %v896_v41  ;;  %v916_v55 = vpack.c.bf16 %v342_v54, %v341_v53  ;;  %v344_v57 = vld [vmem:[%s1293_s5 + $0x68] sm:$0xff]  ;;  %v608_v59 = vld [vmem:[%s1290_s2] ss:$0 sm:$0xff]  ;;  %v473_v32 = vld [vmem:[%s1295_s7 + $0x30] sm:$0xff] }
  0x21   :  { %716 = vmatmul.mubr.msk.f32.gmra.mrb[2].mxu0 %vm65_vm0, %v49_v20  ;;  %877 = vmatprep.subr.bf16.mxu1 %v876_v22  ;;  %v920_v58 = vpack.c.bf16 %v344_v57, %v343_v56  ;;  %v345_v20 = vld [vmem:[%s1293_s5 + $0x70] sm:$0xff]  ;;  %v467_v23 = vld [vmem:[%s1295_s7] sm:$0xff]  ;;  %v468_v24 = vld [vmem:[%s1295_s7 + $0x8] sm:$0xff] }
  0x22   :  { %718 = vmatprep.mubr.msk.f32.mxu0 %vm65_vm0, %v50_v21  ;;  %901 = vmatprep.subr.bf16.mxu0 %v900_v43  ;;  %v346_v21 = vld [vmem:[%s1293_s5 + $0x78] sm:$0xff]  ;;  %v471_v29 = vld [vmem:[%s1295_s7 + $0x20] sm:$0xff]  ;;  %v476_v36 = vld [vmem:[%s1295_s7 + $0x48] sm:$0xff] }
  0x23   :  { %v474_v33 = vld [vmem:[%s1295_s7 + $0x38] sm:$0xff]  ;;  %v475_v35 = vld [vmem:[%s1295_s7 + $0x40] sm:$0xff]  ;;  %v477_v38 = vld [vmem:[%s1295_s7 + $0x50] sm:$0xff] }
  0x24   :  { %879 = vmatpush3.bf16.msra.mxu1 %v876_v22  ;;  %903 = vmatpush3.bf16.msra.mxu0 %v900_v43  ;;  %v924_v22 = vpack.c.bf16 %v346_v21, %v345_v20  ;;  %v478_v39 = vld [vmem:[%s1295_s7 + $0x58] sm:$0xff]  ;;  %v479_v41 = vld [vmem:[%s1295_s7 + $0x60] sm:$0xff]  ;;  %v480_v42 = vld [vmem:[%s1295_s7 + $0x68] sm:$0xff] }
  0x25   :  { %719 = vmatmul.mubr.msk.f32.gmra.mrb[4].mxu0 %vm65_vm0, %v51_v25  ;;  %881 = vmatprep.subr.bf16.mxu1 %v880_v27  ;;  %v469_v25 = vld [vmem:[%s1295_s7 + $0x10] sm:$0xff]  ;;  %v948_v40 = vpack.c.bf16 %v478_v39, %v477_v38  ;;  %v952_v43 = vpack.c.bf16 %v480_v42, %v479_v41  ;;  %v617_v44 = vld [vmem:[%s1292_s4] ss:$0 sm:$0xff] }
  0x26   :  { %721 = vmatprep.mubr.msk.f32.mxu0 %vm65_vm0, %v52_v26  ;;  %905 = vmatprep.subr.bf16.mxu0 %v904_v46  ;;  %v928_v26 = vpack.c.bf16 %v468_v24, %v467_v23 }
  0x28   :  { %883 = vmatpush3.bf16.msra.mxu1 %v880_v27  ;;  %907 = vmatpush3.bf16.msra.mxu0 %v904_v46  ;;  %v470_v27 = vld [vmem:[%s1295_s7 + $0x18] sm:$0xff] }
  0x29   :  { %722 = vmatmul.mubr.msk.f32.gmra.mrb[6].mxu0 %vm65_vm0, %v53_v30  ;;  %885 = vmatprep.subr.bf16.mxu1 %v884_v31  ;;  %v932_v28 = vpack.c.bf16 %v470_v27, %v469_v25  ;;  %v472_v30 = vld [vmem:[%s1295_s7 + $0x28] sm:$0xff]  ;;  %v619_v25 = vld [vmem:[%s1296_s8] ss:$0 sm:$0xff] }
  0x2a   :  { %909 = vmatprep.subr.bf16.mxu0 %v908_v49 }
  0x2c   :  { %887 = vmatpush3.bf16.msra.mxu1 %v884_v31  ;;  %911 = vmatpush3.bf16.msra.mxu0 %v908_v49  ;;  %v936_v31 = vpack.c.bf16 %v472_v30, %v471_v29 }
  0x2d   :  { %889 = vmatprep.subr.bf16.mxu1 %v888_v34  ;;  %913 = vmatprep.subr.bf16.mxu0 %v912_v52 }
  0x30   :  { %891 = vmatpush3.bf16.msra.mxu1 %v888_v34  ;;  %915 = vmatpush3.bf16.msra.mxu0 %v912_v52  ;;  %v940_v34 = vpack.c.bf16 %v474_v33, %v473_v32 }
  0x31   :  { %893 = vmatprep.subr.bf16.mxu1 %v892_v37  ;;  %917 = vmatprep.subr.bf16.mxu0 %v916_v55 }
  0x34   :  { %895 = vmatpush3.bf16.msra.mxu1 %v892_v37  ;;  %919 = vmatpush3.bf16.msra.mxu0 %v916_v55  ;;  %v944_v37 = vpack.c.bf16 %v476_v36, %v475_v35 }
  0x35   :  { %921 = vmatprep.subr.bf16.mxu0 %v920_v58  ;;  %960 = vmatprep.subr.bf16.mxu1 %v928_v26 }
  0x38   :  { %923 = vmatpush3.bf16.msra.mxu0 %v920_v58 }
  0x39   :  { %925 = vmatprep.subr.bf16.mxu0 %v924_v22 }
  0x3c   :  { %927 = vmatpush3.bf16.msra.mxu0 %v924_v22 }
  0x3d   :  { %929 = vmatprep.subr.bf16.mxu0 %v928_v26 }
  0xf0   :  { %v714_v60 = vpop.f32.mrb[0].mxu0 }
  0xf1   :  { %v162_v61 = vadd.f32 %v714_v60, %v608_v59  ;;  %v156_v62 = vpop.f32.mrb[1].mxu0 }
  0xf2   :  { %v157_v63 = vadd.f32 %v608_v59, %v156_v62  ;;  %v482_v62 = vld [vmem:[%s1295_s7 + $0x78] sm:$0xff] }
  0xf3   :  { %v196_v2 = vmax.f32 %v162_v61, 0.0  ;;  %v481_v61 = vld [vmem:[%s1295_s7 + $0x70] sm:$0xff] }
  0xf4   :  { %v717_v0 = vpop.f32.mrb[2].mxu0  ;;  %v195_v1 = vmax.f32 %v157_v63, 0.0  ;;  %v956_v63 = vpack.c.bf16 %v482_v62, %v481_v61 }
  0xf5   :  { %v172_v3 = vadd.f32 %v717_v0, %v608_v59  ;;  %v166_v4 = vpop.f32.mrb[3].mxu0  ;;  %v618_v0 = vld [vmem:[%s1294_s6] ss:$0 sm:$0xff] }
  0xf6   :  { %v167_v5 = vadd.f32 %v608_v59, %v166_v4  ;;  %756 = vmatprep.mubr.f32.mxu1 %v195_v1 }
  0xf7   :  { %757 = vmatmul.mubr.f32.vlgmr.msra.gmra.mrb[0].mxu1 %v196_v2  ;;  %v198_v8 = vmax.f32 %v172_v3, 0.0 }
  0xf8   :  { %v197_v6 = vmax.f32 %v167_v5, 0.0  ;;  %v720_v7 = vpop.f32.mrb[4].mxu0  ;;  %968 = vmatpush3.bf16.msra.mxu1 %v928_v26 }
  0xf9   :  { %v182_v9 = vadd.f32 %v720_v7, %v608_v59  ;;  %v176_v10 = vpop.f32.mrb[5].mxu0  ;;  %961 = vmatprep.subr.bf16.mxu1 %v932_v28 }
  0xfa   :  { %v177_v11 = vadd.f32 %v608_v59, %v176_v10  ;;  %759 = vmatprep.mubr.f32.mxu1 %v197_v6 }
  0xfb   :  { %760 = vmatmul.mubr.f32.gmra.mrb[2].mxu1 %v198_v8  ;;  %v200_v14 = vmax.f32 %v182_v9, 0.0 }
  0xfc   :  { %v199_v12 = vmax.f32 %v177_v11, 0.0  ;;  %v723_v13 = vpop.f32.mrb[6].mxu0  ;;  %969 = vmatpush3.bf16.msra.mxu1 %v932_v28 }
  0xfd   :  { %v192_v15 = vadd.f32 %v723_v13, %v608_v59  ;;  %v186_v16 = vpop.f32.mrb[7].mxu0  ;;  %962 = vmatprep.subr.bf16.mxu1 %v936_v31 }
  0xfe   :  { %v187_v17 = vadd.f32 %v608_v59, %v186_v16  ;;  %762 = vmatprep.mubr.f32.mxu1 %v199_v12 }
  0xff   :  { %763 = vmatmul.mubr.f32.gmra.mrb[4].mxu1 %v200_v14  ;;  %v202_v19 = vmax.f32 %v192_v15, 0.0 }
 0x100   :  { %v201_v18 = vmax.f32 %v187_v17, 0.0  ;;  %970 = vmatpush3.bf16.msra.mxu1 %v936_v31 }
 0x101   :  { %963 = vmatprep.subr.bf16.mxu1 %v940_v34 }
 0x102   :  { %765 = vmatprep.mubr.f32.mxu1 %v201_v18 }
 0x103   :  { %766 = vmatmul.mubr.f32.gmra.mrb[6].mxu1 %v202_v19 }
 0x104   :  { %971 = vmatpush3.bf16.msra.mxu1 %v940_v34 }
 0x105   :  { %964 = vmatprep.subr.bf16.mxu1 %v944_v37 }
 0x108   :  { %972 = vmatpush3.bf16.msra.mxu1 %v944_v37 }
 0x109   :  { %965 = vmatprep.subr.bf16.mxu1 %v948_v40 }
 0x10c   :  { %973 = vmatpush3.bf16.msra.mxu1 %v948_v40 }
 0x10d   :  { %966 = vmatprep.subr.bf16.mxu1 %v952_v43 }
 0x110   :  { %974 = vmatpush3.bf16.msra.mxu1 %v952_v43 }
 0x111   :  { %967 = vmatprep.subr.bf16.mxu1 %v956_v63 }
 0x114   :  { %975 = vmatpush3.bf16.msra.mxu1 %v956_v63 }
 0x1ca   :  { %v758_v45 = vpop.f32.mrb[0].mxu1 }
 0x1cb   :  { %v292_v46 = vpop.f32.mrb[1].mxu1  ;;  %v298_v48 = vadd.f32 %v758_v45, %v617_v44 }
 0x1cc   :  { %v293_v47 = vadd.f32 %v617_v44, %v292_v46 }
 0x1ce   :  { %v761_v49 = vpop.f32.mrb[2].mxu1  ;;  %800 = vmatprep.mubr.f32.mxu0 %v293_v47 }
 0x1cf   :  { %v302_v50 = vpop.f32.mrb[3].mxu1  ;;  %801 = vmatmul.mubr.f32.vlgmr.msra.gmra.mrb[8].mxu0 %v298_v48  ;;  %v308_v52 = vadd.f32 %v761_v49, %v617_v44 }
 0x1d0   :  { %v303_v51 = vadd.f32 %v617_v44, %v302_v50  ;;  %931 = vmatpush3.bf16.msra.mxu0 %v928_v26 }
 0x1d1   :  { %933 = vmatprep.subr.bf16.mxu0 %v932_v28 }
 0x1d2   :  { %v764_v53 = vpop.f32.mrb[4].mxu1  ;;  %803 = vmatprep.mubr.f32.mxu0 %v303_v51 }
 0x1d3   :  { %v312_v54 = vpop.f32.mrb[5].mxu1  ;;  %804 = vmatmul.mubr.f32.gmra.mrb[10].mxu0 %v308_v52  ;;  %v318_v56 = vadd.f32 %v764_v53, %v617_v44 }
 0x1d4   :  { %v313_v55 = vadd.f32 %v617_v44, %v312_v54  ;;  %935 = vmatpush3.bf16.msra.mxu0 %v932_v28 }
 0x1d5   :  { %937 = vmatprep.subr.bf16.mxu0 %v936_v31 }
 0x1d6   :  { %v767_v57 = vpop.f32.mrb[6].mxu1  ;;  %806 = vmatprep.mubr.f32.mxu0 %v313_v55 }
 0x1d7   :  { %v322_v58 = vpop.f32.mrb[7].mxu1  ;;  %807 = vmatmul.mubr.f32.gmra.mrb[12].mxu0 %v318_v56  ;;  %v328_v60 = vadd.f32 %v767_v57, %v617_v44 }
 0x1d8   :  { %v323_v59 = vadd.f32 %v617_v44, %v322_v58  ;;  %939 = vmatpush3.bf16.msra.mxu0 %v936_v31 }
 0x1d9   :  { %941 = vmatprep.subr.bf16.mxu0 %v940_v34 }
 0x1da   :  { %809 = vmatprep.mubr.f32.mxu0 %v323_v59 }
 0x1db   :  { %810 = vmatmul.mubr.f32.gmra.mrb[14].mxu0 %v328_v60 }
 0x1dc   :  { %943 = vmatpush3.bf16.msra.mxu0 %v940_v34 }
 0x1dd   :  { %945 = vmatprep.subr.bf16.mxu0 %v944_v37 }
 0x1e0   :  { %947 = vmatpush3.bf16.msra.mxu0 %v944_v37 }
 0x1e1   :  { %949 = vmatprep.subr.bf16.mxu0 %v948_v40 }
 0x1e4   :  { %951 = vmatpush3.bf16.msra.mxu0 %v948_v40 }
 0x1e5   :  { %953 = vmatprep.subr.bf16.mxu0 %v952_v43 }
 0x1e8   :  { %955 = vmatpush3.bf16.msra.mxu0 %v952_v43 }
 0x1e9   :  { %957 = vmatprep.subr.bf16.mxu0 %v956_v63 }
 0x1ec   :  { %959 = vmatpush3.bf16.msra.mxu0 %v956_v63 }
 0x2a2   :  { %v802_v1 = vpop.f32.mrb[8].mxu0 }
 0x2a3   :  { %v426_v2 = vadd.f32 %v802_v1, %v618_v0  ;;  %v420_v3 = vpop.f32.mrb[9].mxu0 }
 0x2a4   :  { %v421_v4 = vadd.f32 %v618_v0, %v420_v3 }
 0x2a5   :  { %v460_v7 = vmax.f32 %v426_v2, 0.0 }
 0x2a6   :  { %v459_v5 = vmax.f32 %v421_v4, 0.0  ;;  %v805_v6 = vpop.f32.mrb[10].mxu0 }
 0x2a7   :  { %v436_v8 = vadd.f32 %v805_v6, %v618_v0  ;;  %v430_v9 = vpop.f32.mrb[11].mxu0 }
 0x2a8   :  { %v431_v10 = vadd.f32 %v618_v0, %v430_v9  ;;  %844 = vmatprep.mubr.f32.mxu0 %v459_v5 }
 0x2a9   :  { %845 = vmatmul.mubr.f32.vlgmr.msra.gmra.mrb[16].mxu0 %v460_v7  ;;  %v462_v13 = vmax.f32 %v436_v8, 0.0 }
 0x2aa   :  { %v461_v11 = vmax.f32 %v431_v10, 0.0  ;;  %v808_v12 = vpop.f32.mrb[12].mxu0 }
 0x2ab   :  { %v446_v14 = vadd.f32 %v808_v12, %v618_v0  ;;  %v440_v15 = vpop.f32.mrb[13].mxu0 }
 0x2ac   :  { %v441_v16 = vadd.f32 %v618_v0, %v440_v15  ;;  %847 = vmatprep.mubr.f32.mxu1 %v461_v11 }
 0x2ad   :  { %848 = vmatmul.mubr.f32.vlgmr.msra.gmra.mrb[8].mxu1 %v462_v13  ;;  %v464_v19 = vmax.f32 %v446_v14, 0.0 }
 0x2ae   :  { %v463_v17 = vmax.f32 %v441_v16, 0.0  ;;  %v811_v18 = vpop.f32.mrb[14].mxu0 }
 0x2af   :  { %v456_v20 = vadd.f32 %v811_v18, %v618_v0  ;;  %v450_v21 = vpop.f32.mrb[15].mxu0 }
 0x2b0   :  { %v451_v22 = vadd.f32 %v618_v0, %v450_v21  ;;  %850 = vmatprep.mubr.f32.mxu1 %v463_v17 }
 0x2b1   :  { %851 = vmatmul.mubr.f32.gmra.mrb[10].mxu1 %v464_v19  ;;  %v466_v24 = vmax.f32 %v456_v20, 0.0 }
 0x2b2   :  { %v465_v23 = vmax.f32 %v451_v22, 0.0 }
 0x2b4   :  { %853 = vmatprep.mubr.f32.mxu1 %v465_v23 }
 0x2b5   :  { %854 = vmatmul.mubr.f32.gmra.mrb[12].mxu1 %v466_v24 }
 0x37c   :  { %v846_v26 = vpop.f32.mrb[16].mxu0 }
 0x37d   :  { %v562_v27 = vadd.f32 %v846_v26, %v619_v25  ;;  %v556_v28 = vpop.f32.mrb[17].mxu0 }
 0x37e   :  { %v557_v29 = vadd.f32 %v619_v25, %v556_v28 }
 0x37f   :  { %596 = vst.msk [vmem:[%s1297_s9 + $0x8] sm:$0xff] %vm65_vm0, %v562_v27 }
 0x380   :  { %595 = vst.msk [vmem:[%s1297_s9] sm:$0xff] %vm65_vm0, %v557_v29  ;;  %v849_v30 = vpop.f32.mrb[8].mxu1 }
 0x381   :  { %v572_v31 = vadd.f32 %v849_v30, %v619_v25  ;;  %v566_v32 = vpop.f32.mrb[9].mxu1 }
 0x382   :  { %v567_v33 = vadd.f32 %v619_v25, %v566_v32 }
 0x383   :  { %598 = vst.msk [vmem:[%s1297_s9 + $0x18] sm:$0xff] %vm65_vm0, %v572_v31 }
 0x384   :  { %597 = vst.msk [vmem:[%s1297_s9 + $0x10] sm:$0xff] %vm65_vm0, %v567_v33  ;;  %v852_v34 = vpop.f32.mrb[10].mxu1 }
 0x385   :  { %v582_v35 = vadd.f32 %v852_v34, %v619_v25  ;;  %v576_v36 = vpop.f32.mrb[11].mxu1 }
 0x386   :  { %v577_v37 = vadd.f32 %v619_v25, %v576_v36 }
 0x387   :  { %600 = vst.msk [vmem:[%s1297_s9 + $0x28] sm:$0xff] %vm65_vm0, %v582_v35 }
 0x388   :  { %599 = vst.msk [vmem:[%s1297_s9 + $0x20] sm:$0xff] %vm65_vm0, %v577_v37  ;;  %v855_v38 = vpop.f32.mrb[12].mxu1 }
 0x389   :  { %v592_v39 = vadd.f32 %v855_v38, %v619_v25  ;;  %v586_v40 = vpop.f32.mrb[13].mxu1 }
 0x38a   :  { %v587_v41 = vadd.f32 %v619_v25, %v586_v40 }
 0x38b   :  { %602 = vst.msk [vmem:[%s1297_s9 + $0x38] sm:$0xff] %vm65_vm0, %v592_v39 }
 0x38c   :  { %601 = vst.msk [vmem:[%s1297_s9 + $0x30] sm:$0xff] %vm65_vm0, %v587_v41 }
 0x38d   :  { %607 = vsyncpa [#allocation3], 1 }

</bundles_post_ra>
